<compile_context>
chip_gen: v6e
topology: v6e:2x2x1
jax: 0.10.0
libtpu: 0.0.40
codegen_flags: <defaults>
</compile_context>

<pallas_src>
import functools

import jax
import jax.numpy as jnp
from jax import lax
from jax.experimental import pallas as pl
from jax.experimental.pallas import tpu as pltpu


# ---------------------------------------------------------------------------
# Fused QKV-projection + multi-head attention + output-projection kernel
# ---------------------------------------------------------------------------
def _make_fused_attn_kernel(num_heads, head_dim, scale, out_dtype, with_weights):
    H, D = num_heads, head_dim
    C = H * D

    def body(x_ref, wqkv_ref, wproj_ref, bproj_ref, out_ref, w_ref):
        # Fused QKV projection: (N, C) @ (C, 3C) -> (N, 3C).
        # Column order of W_qkv is [qkv(3), head(H), dim(D)], matching
        # nn.Linear(dim, 3*dim) followed by reshape(B, N, 3, H, D).
        qkv = jnp.dot(x_ref[...], wqkv_ref[...],
                      preferred_element_type=jnp.float32)          # (N, 3C) f32

        ctx = []
        for h in range(H):
            # Static lane slices of the in-VMEM qkv value (no HBM shuffle).
            q = (qkv[:, h * D:(h + 1) * D] * scale).astype(jnp.bfloat16)
            k = qkv[:, C + h * D:C + (h + 1) * D].astype(jnp.bfloat16)
            v = qkv[:, 2 * C + h * D:2 * C + (h + 1) * D].astype(jnp.bfloat16)

            # scores = q @ k^T without materializing a transpose: contract the
            # last (lane) dim of both operands.
            s = lax.dot_general(q, k, (((1,), (1,)), ((), ())),
                                preferred_element_type=jnp.float32)  # (N, N)

            # Softmax in f32; reciprocal goes to the EUP slot instead of VALU.
            m = jnp.max(s, axis=-1, keepdims=True)
            p = jnp.exp(s - m)
            l = jnp.sum(p, axis=-1, keepdims=True)
            p = p * pl.reciprocal(l, approx=True)

            if with_weights:
                w_ref[h, :, :] = p          # pre-dropout weights (drop p = 0.0)

            ctx.append(jnp.dot(p.astype(jnp.bfloat16), v,
                               preferred_element_type=jnp.float32))  # (N, D)

        # Re-assemble heads along lanes -> (N, C): lane-dense output, no XLA
        # transpose/reshape pass between attention and the output projection.
        ctx = jnp.concatenate(ctx, axis=-1).astype(jnp.bfloat16)

        out = jnp.dot(ctx, wproj_ref[...],
                      preferred_element_type=jnp.float32) + bproj_ref[...]
        out_ref[...] = out.astype(out_dtype)

    if with_weights:
        def kernel(x_ref, wqkv_ref, wproj_ref, bproj_ref, out_ref, w_ref):
            body(x_ref, wqkv_ref, wproj_ref, bproj_ref, out_ref, w_ref)
    else:
        def kernel(x_ref, wqkv_ref, wproj_ref, bproj_ref, out_ref):
            body(x_ref, wqkv_ref, wproj_ref, bproj_ref, out_ref, None)
    return kernel


# ---------------------------------------------------------------------------
# Full Attention forward (matches the PyTorch module: returns (x, weights))
# ---------------------------------------------------------------------------
@functools.partial(jax.jit, static_argnames=("num_heads", "return_weights"))
def attention_forward(x, params, num_heads, return_weights=True):
    B, N, C = x.shape
    H = num_heads
    D = C // H
    scale = float(D) ** (-0.5)          # qk_scale=None in the module

    # Cast activations / weights to bf16 for the MXU (accumulation stays f32).
    x_bf = x.astype(jnp.bfloat16)
    w_qkv = params["w_qkv"].astype(jnp.bfloat16)     # (C, 3C)
    w_proj = params["w_proj"].astype(jnp.bfloat16)   # (C, C)
    b_proj = params["b_proj"].astype(jnp.float32)    # (1, C)

    kernel = _make_fused_attn_kernel(H, D, scale, x.dtype, return_weights)

    out_shape = [jax.ShapeDtypeStruct((B, N, C), x.dtype)]
    out_specs = [pl.BlockSpec((None, N, C), lambda b: (b, 0, 0))]
    if return_weights:
        out_shape.append(jax.ShapeDtypeStruct((B, H, N, N), jnp.float32))
        out_specs.append(pl.BlockSpec((None, H, N, N), lambda b: (b, 0, 0, 0)))

    results = pl.pallas_call(
        kernel,
        out_shape=tuple(out_shape),
        grid=(B,),
        in_specs=[
            pl.BlockSpec((None, N, C), lambda b: (b, 0, 0)),   # x
            pl.BlockSpec((C, 3 * C), lambda b: (0, 0)),        # W_qkv
            pl.BlockSpec((C, C), lambda b: (0, 0)),            # W_proj
            pl.BlockSpec((1, C), lambda b: (0, 0)),            # b_proj
        ],
        out_specs=tuple(out_specs),
        compiler_params=pltpu.CompilerParams(
            dimension_semantics=("parallel",),
        ),
    )(x_bf, w_qkv, w_proj, b_proj)

    if return_weights:
        out, weights = results
        return out, weights
    (out,) = results
    return out, None


def init_params(key, dim):
    k1, k2, k3 = jax.random.split(key, 3)
    # Shapes match nn.Linear(dim, 3*dim) / nn.Linear(dim, dim); stored already
    # transposed for the x @ W convention (qkv_bias=False -> no qkv bias).
    w_qkv = jax.random.normal(k1, (dim, 3 * dim), jnp.float32) * 0.05
    w_proj = jax.random.normal(k2, (dim, dim), jnp.float32) * 0.05
    b_proj = jax.random.normal(k3, (1, dim), jnp.float32) * 0.05
    return {"w_qkv": w_qkv, "w_proj": w_proj, "b_proj": b_proj}


if __name__ == "__main__":
    B, N, C = 2, 8, 32
    num_heads = 8

    key = jax.random.PRNGKey(0)
    kx, kp = jax.random.split(key)
    x = jax.random.normal(kx, (B, N, C), jnp.float32)
    params = init_params(kp, C)

    # Full path (matches module semantics: returns projected output + weights).
    out, weights = attention_forward(x, params, num_heads, return_weights=True)
    out = jax.block_until_ready(out)
    weights = jax.block_until_ready(weights)

    assert out.shape == (B, N, C)
    assert weights.shape == (B, num_heads, N, N)

    # Fast inference path: skip the O(N^2) softmax-weights HBM writeback.
    out_fast, _ = attention_forward(x, params, num_heads, return_weights=False)
    out_fast = jax.block_until_ready(out_fast)

    # Pure-JAX f32 reference; kernel matmuls run in bf16 (f32 accumulation),
    # so use bf16-appropriate tolerances.
    def ref_forward(x):
        H = num_heads
        D = C // H
        scale = D ** (-0.5)
        qkv = (x @ params["w_qkv"]).reshape(B, N, 3, H, D).transpose(2, 0, 3, 1, 4)
        q, k, v = qkv[0], qkv[1], qkv[2]
        attn = jnp.einsum("bhnd,bhmd->bhnm", q, k) * scale
        attn = jax.nn.softmax(attn, axis=-1)
        o = jnp.einsum("bhnm,bhmd->bhnd", attn, v)
        o = o.transpose(0, 2, 1, 3).reshape(B, N, C)
        o = o @ params["w_proj"] + params["b_proj"]
        return o, attn

    ref_out, ref_w = ref_forward(x)
    assert jnp.allclose(out, ref_out, atol=2e-2, rtol=2e-2)
    assert jnp.allclose(weights, ref_w, atol=2e-2, rtol=2e-2)
    assert jnp.allclose(out_fast, out, atol=1e-5, rtol=1e-5)

    print("KERNEL_OK")
</pallas_src>

<mosaic_0001>
module attributes {stable_mosaic.version = 11 : i64} {
  func.func @kernel(%arg0: i32, %arg1: memref<1x8x32xbf16, #tpu.memory_space<vmem>>, %arg2: memref<32x96xbf16, #tpu.memory_space<vmem>>, %arg3: memref<32x32xbf16, #tpu.memory_space<vmem>>, %arg4: memref<1x32xf32, #tpu.memory_space<vmem>>, %arg5: memref<1x8x32xf32, #tpu.memory_space<vmem>>, %arg6: memref<1x8x8x8xf32, #tpu.memory_space<vmem>>) attributes {dimension_semantics = [#tpu.dimension_semantics<parallel>], iteration_bounds = array<i64: 2>, scalar_prefetch = 0 : i64, scratch_operands = 0 : i64, tpu.core_type = #tpu.core_type<tc>, window_params = [{transform_indices = @transform_0, window_bounds = array<i64: 1, 8, 32>}, {pipeline_mode = #tpu.pipeline_mode<synchronous>, transform_indices = @transform_1, window_bounds = array<i64: 32, 96>}, {pipeline_mode = #tpu.pipeline_mode<synchronous>, transform_indices = @transform_2, window_bounds = array<i64: 32, 32>}, {pipeline_mode = #tpu.pipeline_mode<synchronous>, transform_indices = @transform_3, window_bounds = array<i64: 1, 32>}, {transform_indices = @transform_4, window_bounds = array<i64: 1, 8, 32>}, {transform_indices = @transform_5, window_bounds = array<i64: 1, 8, 8, 8>}]} {
    %c0 = arith.constant 0 : index
    %c0_0 = arith.constant 0 : index
    %c0_1 = arith.constant 0 : index
    %0 = vector.load %arg1[%c0, %c0_0, %c0_1] : memref<1x8x32xbf16, #tpu.memory_space<vmem>>, vector<1x8x32xbf16>
    %1 = vector.shape_cast %0 : vector<1x8x32xbf16> to vector<8x32xbf16>
    %c0_2 = arith.constant 0 : index
    %c0_3 = arith.constant 0 : index
    %2 = vector.load %arg2[%c0_2, %c0_3] : memref<32x96xbf16, #tpu.memory_space<vmem>>, vector<32x96xbf16>
    %cst = arith.constant dense<0.000000e+00> : vector<8x96xf32>
    %3 = tpu.matmul %1, %2, %cst {dimension_numbers = #tpu.dot_dimension_numbers<[1], [0], [0], [1], [0, 0, 1, 1], [], []>} : vector<8x32xbf16>, vector<32x96xbf16>, vector<8x96xf32> -> vector<8x96xf32>
    %4 = vector.extract_strided_slice %3 {offsets = [0, 0], sizes = [8, 4], strides = [1, 1]} : vector<8x96xf32> to vector<8x4xf32>
    %cst_4 = arith.constant 5.000000e-01 : f32
    %5 = vector.broadcast %cst_4 : f32 to vector<8x4xf32>
    %6 = arith.mulf %4, %5 : vector<8x4xf32>
    %7 = arith.truncf %6 : vector<8x4xf32> to vector<8x4xbf16>
    %8 = vector.extract_strided_slice %3 {offsets = [0, 32], sizes = [8, 4], strides = [1, 1]} : vector<8x96xf32> to vector<8x4xf32>
    %9 = arith.truncf %8 : vector<8x4xf32> to vector<8x4xbf16>
    %10 = vector.extract_strided_slice %3 {offsets = [0, 64], sizes = [8, 4], strides = [1, 1]} : vector<8x96xf32> to vector<8x4xf32>
    %11 = arith.truncf %10 : vector<8x4xf32> to vector<8x4xbf16>
    %cst_5 = arith.constant dense<0.000000e+00> : vector<8x8xf32>
    %12 = tpu.matmul %7, %9, %cst_5 {dimension_numbers = #tpu.dot_dimension_numbers<[1], [1], [0], [0], [0, 0, 1, 0], [], []>} : vector<8x4xbf16>, vector<8x4xbf16>, vector<8x8xf32> -> vector<8x8xf32>
    %cst_6 = arith.constant dense<0xFF800000> : vector<8xf32>
    %13 = vector.multi_reduction <maximumf>, %12, %cst_6 [1] : vector<8x8xf32> to vector<8xf32>
    %14 = vector.shape_cast %13 : vector<8xf32> to vector<8x1xf32>
    %15 = vector.broadcast %14 : vector<8x1xf32> to vector<8x8xf32>
    %16 = arith.subf %12, %15 : vector<8x8xf32>
    %17 = math.exp %16 : vector<8x8xf32>
    %cst_7 = arith.constant dense<0.000000e+00> : vector<8xf32>
    %18 = vector.multi_reduction <add>, %17, %cst_7 [1] : vector<8x8xf32> to vector<8xf32>
    %19 = vector.shape_cast %18 : vector<8xf32> to vector<8x1xf32>
    %20 = tpu.reciprocal %19 {approx = true} : vector<8x1xf32> -> vector<8x1xf32>
    %21 = vector.broadcast %20 : vector<8x1xf32> to vector<8x8xf32>
    %22 = arith.mulf %17, %21 : vector<8x8xf32>
    %c0_8 = arith.constant 0 : index
    %c0_9 = arith.constant 0 : index
    %c0_10 = arith.constant 0 : index
    %c0_11 = arith.constant 0 : index
    %23 = vector.load %arg6[%c0_8, %c0_9, %c0_10, %c0_11] : memref<1x8x8x8xf32, #tpu.memory_space<vmem>>, vector<1x1x8x8xf32>
    %24 = vector.shape_cast %23 : vector<1x1x8x8xf32> to vector<8x8xf32>
    %25 = vector.shape_cast %22 : vector<8x8xf32> to vector<1x1x8x8xf32>
    tpu.vector_store %arg6[%c0_8, %c0_9, %c0_10, %c0_11], %25 {strides = array<i32>} : memref<1x8x8x8xf32, #tpu.memory_space<vmem>>, vector<1x1x8x8xf32>,
    %26 = arith.truncf %22 : vector<8x8xf32> to vector<8x8xbf16>
    %cst_12 = arith.constant dense<0.000000e+00> : vector<8x4xf32>
    %27 = tpu.matmul %26, %11, %cst_12 {dimension_numbers = #tpu.dot_dimension_numbers<[1], [0], [0], [1], [0, 0, 1, 1], [], []>} : vector<8x8xbf16>, vector<8x4xbf16>, vector<8x4xf32> -> vector<8x4xf32>
    %28 = vector.extract_strided_slice %3 {offsets = [0, 4], sizes = [8, 4], strides = [1, 1]} : vector<8x96xf32> to vector<8x4xf32>
    %cst_13 = arith.constant 5.000000e-01 : f32
    %29 = vector.broadcast %cst_13 : f32 to vector<8x4xf32>
    %30 = arith.mulf %28, %29 : vector<8x4xf32>
    %31 = arith.truncf %30 : vector<8x4xf32> to vector<8x4xbf16>
    %32 = vector.extract_strided_slice %3 {offsets = [0, 36], sizes = [8, 4], strides = [1, 1]} : vector<8x96xf32> to vector<8x4xf32>
    %33 = arith.truncf %32 : vector<8x4xf32> to vector<8x4xbf16>
    %34 = vector.extract_strided_slice %3 {offsets = [0, 68], sizes = [8, 4], strides = [1, 1]} : vector<8x96xf32> to vector<8x4xf32>
    %35 = arith.truncf %34 : vector<8x4xf32> to vector<8x4xbf16>
    %cst_14 = arith.constant dense<0.000000e+00> : vector<8x8xf32>
    %36 = tpu.matmul %31, %33, %cst_14 {dimension_numbers = #tpu.dot_dimension_numbers<[1], [1], [0], [0], [0, 0, 1, 0], [], []>} : vector<8x4xbf16>, vector<8x4xbf16>, vector<8x8xf32> -> vector<8x8xf32>
    %cst_15 = arith.constant dense<0xFF800000> : vector<8xf32>
    %37 = vector.multi_reduction <maximumf>, %36, %cst_15 [1] : vector<8x8xf32> to vector<8xf32>
    %38 = vector.shape_cast %37 : vector<8xf32> to vector<8x1xf32>
    %39 = vector.broadcast %38 : vector<8x1xf32> to vector<8x8xf32>
    %40 = arith.subf %36, %39 : vector<8x8xf32>
    %41 = math.exp %40 : vector<8x8xf32>
    %cst_16 = arith.constant dense<0.000000e+00> : vector<8xf32>
    %42 = vector.multi_reduction <add>, %41, %cst_16 [1] : vector<8x8xf32> to vector<8xf32>
    %43 = vector.shape_cast %42 : vector<8xf32> to vector<8x1xf32>
    %44 = tpu.reciprocal %43 {approx = true} : vector<8x1xf32> -> vector<8x1xf32>
    %45 = vector.broadcast %44 : vector<8x1xf32> to vector<8x8xf32>
    %46 = arith.mulf %41, %45 : vector<8x8xf32>
    %c0_17 = arith.constant 0 : index
    %c1 = arith.constant 1 : index
    %c0_18 = arith.constant 0 : index
    %c0_19 = arith.constant 0 : index
    %47 = vector.load %arg6[%c0_17, %c1, %c0_18, %c0_19] : memref<1x8x8x8xf32, #tpu.memory_space<vmem>>, vector<1x1x8x8xf32>
    %48 = vector.shape_cast %47 : vector<1x1x8x8xf32> to vector<8x8xf32>
    %49 = vector.shape_cast %46 : vector<8x8xf32> to vector<1x1x8x8xf32>
    tpu.vector_store %arg6[%c0_17, %c1, %c0_18, %c0_19], %49 {strides = array<i32>} : memref<1x8x8x8xf32, #tpu.memory_space<vmem>>, vector<1x1x8x8xf32>,
    %50 = arith.truncf %46 : vector<8x8xf32> to vector<8x8xbf16>
    %cst_20 = arith.constant dense<0.000000e+00> : vector<8x4xf32>
    %51 = tpu.matmul %50, %35, %cst_20 {dimension_numbers = #tpu.dot_dimension_numbers<[1], [0], [0], [1], [0, 0, 1, 1], [], []>} : vector<8x8xbf16>, vector<8x4xbf16>, vector<8x4xf32> -> vector<8x4xf32>
    %52 = vector.extract_strided_slice %3 {offsets = [0, 8], sizes = [8, 4], strides = [1, 1]} : vector<8x96xf32> to vector<8x4xf32>
    %cst_21 = arith.constant 5.000000e-01 : f32
    %53 = vector.broadcast %cst_21 : f32 to vector<8x4xf32>
    %54 = arith.mulf %52, %53 : vector<8x4xf32>
    %55 = arith.truncf %54 : vector<8x4xf32> to vector<8x4xbf16>
    %56 = vector.extract_strided_slice %3 {offsets = [0, 40], sizes = [8, 4], strides = [1, 1]} : vector<8x96xf32> to vector<8x4xf32>
    %57 = arith.truncf %56 : vector<8x4xf32> to vector<8x4xbf16>
    %58 = vector.extract_strided_slice %3 {offsets = [0, 72], sizes = [8, 4], strides = [1, 1]} : vector<8x96xf32> to vector<8x4xf32>
    %59 = arith.truncf %58 : vector<8x4xf32> to vector<8x4xbf16>
    %cst_22 = arith.constant dense<0.000000e+00> : vector<8x8xf32>
    %60 = tpu.matmul %55, %57, %cst_22 {dimension_numbers = #tpu.dot_dimension_numbers<[1], [1], [0], [0], [0, 0, 1, 0], [], []>} : vector<8x4xbf16>, vector<8x4xbf16>, vector<8x8xf32> -> vector<8x8xf32>
    %cst_23 = arith.constant dense<0xFF800000> : vector<8xf32>
    %61 = vector.multi_reduction <maximumf>, %60, %cst_23 [1] : vector<8x8xf32> to vector<8xf32>
    %62 = vector.shape_cast %61 : vector<8xf32> to vector<8x1xf32>
    %63 = vector.broadcast %62 : vector<8x1xf32> to vector<8x8xf32>
    %64 = arith.subf %60, %63 : vector<8x8xf32>
    %65 = math.exp %64 : vector<8x8xf32>
    %cst_24 = arith.constant dense<0.000000e+00> : vector<8xf32>
    %66 = vector.multi_reduction <add>, %65, %cst_24 [1] : vector<8x8xf32> to vector<8xf32>
    %67 = vector.shape_cast %66 : vector<8xf32> to vector<8x1xf32>
    %68 = tpu.reciprocal %67 {approx = true} : vector<8x1xf32> -> vector<8x1xf32>
    %69 = vector.broadcast %68 : vector<8x1xf32> to vector<8x8xf32>
    %70 = arith.mulf %65, %69 : vector<8x8xf32>
    %c0_25 = arith.constant 0 : index
    %c2 = arith.constant 2 : index
    %c0_26 = arith.constant 0 : index
    %c0_27 = arith.constant 0 : index
    %71 = vector.load %arg6[%c0_25, %c2, %c0_26, %c0_27] : memref<1x8x8x8xf32, #tpu.memory_space<vmem>>, vector<1x1x8x8xf32>
    %72 = vector.shape_cast %71 : vector<1x1x8x8xf32> to vector<8x8xf32>
    %73 = vector.shape_cast %70 : vector<8x8xf32> to vector<1x1x8x8xf32>
    tpu.vector_store %arg6[%c0_25, %c2, %c0_26, %c0_27], %73 {strides = array<i32>} : memref<1x8x8x8xf32, #tpu.memory_space<vmem>>, vector<1x1x8x8xf32>,
    %74 = arith.truncf %70 : vector<8x8xf32> to vector<8x8xbf16>
    %cst_28 = arith.constant dense<0.000000e+00> : vector<8x4xf32>
    %75 = tpu.matmul %74, %59, %cst_28 {dimension_numbers = #tpu.dot_dimension_numbers<[1], [0], [0], [1], [0, 0, 1, 1], [], []>} : vector<8x8xbf16>, vector<8x4xbf16>, vector<8x4xf32> -> vector<8x4xf32>
    %76 = vector.extract_strided_slice %3 {offsets = [0, 12], sizes = [8, 4], strides = [1, 1]} : vector<8x96xf32> to vector<8x4xf32>
    %cst_29 = arith.constant 5.000000e-01 : f32
    %77 = vector.broadcast %cst_29 : f32 to vector<8x4xf32>
    %78 = arith.mulf %76, %77 : vector<8x4xf32>
    %79 = arith.truncf %78 : vector<8x4xf32> to vector<8x4xbf16>
    %80 = vector.extract_strided_slice %3 {offsets = [0, 44], sizes = [8, 4], strides = [1, 1]} : vector<8x96xf32> to vector<8x4xf32>
    %81 = arith.truncf %80 : vector<8x4xf32> to vector<8x4xbf16>
    %82 = vector.extract_strided_slice %3 {offsets = [0, 76], sizes = [8, 4], strides = [1, 1]} : vector<8x96xf32> to vector<8x4xf32>
    %83 = arith.truncf %82 : vector<8x4xf32> to vector<8x4xbf16>
    %cst_30 = arith.constant dense<0.000000e+00> : vector<8x8xf32>
    %84 = tpu.matmul %79, %81, %cst_30 {dimension_numbers = #tpu.dot_dimension_numbers<[1], [1], [0], [0], [0, 0, 1, 0], [], []>} : vector<8x4xbf16>, vector<8x4xbf16>, vector<8x8xf32> -> vector<8x8xf32>
    %cst_31 = arith.constant dense<0xFF800000> : vector<8xf32>
    %85 = vector.multi_reduction <maximumf>, %84, %cst_31 [1] : vector<8x8xf32> to vector<8xf32>
    %86 = vector.shape_cast %85 : vector<8xf32> to vector<8x1xf32>
    %87 = vector.broadcast %86 : vector<8x1xf32> to vector<8x8xf32>
    %88 = arith.subf %84, %87 : vector<8x8xf32>
    %89 = math.exp %88 : vector<8x8xf32>
    %cst_32 = arith.constant dense<0.000000e+00> : vector<8xf32>
    %90 = vector.multi_reduction <add>, %89, %cst_32 [1] : vector<8x8xf32> to vector<8xf32>
    %91 = vector.shape_cast %90 : vector<8xf32> to vector<8x1xf32>
    %92 = tpu.reciprocal %91 {approx = true} : vector<8x1xf32> -> vector<8x1xf32>
    %93 = vector.broadcast %92 : vector<8x1xf32> to vector<8x8xf32>
    %94 = arith.mulf %89, %93 : vector<8x8xf32>
    %c0_33 = arith.constant 0 : index
    %c3 = arith.constant 3 : index
    %c0_34 = arith.constant 0 : index
    %c0_35 = arith.constant 0 : index
    %95 = vector.load %arg6[%c0_33, %c3, %c0_34, %c0_35] : memref<1x8x8x8xf32, #tpu.memory_space<vmem>>, vector<1x1x8x8xf32>
    %96 = vector.shape_cast %95 : vector<1x1x8x8xf32> to vector<8x8xf32>
    %97 = vector.shape_cast %94 : vector<8x8xf32> to vector<1x1x8x8xf32>
    tpu.vector_store %arg6[%c0_33, %c3, %c0_34, %c0_35], %97 {strides = array<i32>} : memref<1x8x8x8xf32, #tpu.memory_space<vmem>>, vector<1x1x8x8xf32>,
    %98 = arith.truncf %94 : vector<8x8xf32> to vector<8x8xbf16>
    %cst_36 = arith.constant dense<0.000000e+00> : vector<8x4xf32>
    %99 = tpu.matmul %98, %83, %cst_36 {dimension_numbers = #tpu.dot_dimension_numbers<[1], [0], [0], [1], [0, 0, 1, 1], [], []>} : vector<8x8xbf16>, vector<8x4xbf16>, vector<8x4xf32> -> vector<8x4xf32>
    %100 = vector.extract_strided_slice %3 {offsets = [0, 16], sizes = [8, 4], strides = [1, 1]} : vector<8x96xf32> to vector<8x4xf32>
    %cst_37 = arith.constant 5.000000e-01 : f32
    %101 = vector.broadcast %cst_37 : f32 to vector<8x4xf32>
    %102 = arith.mulf %100, %101 : vector<8x4xf32>
    %103 = arith.truncf %102 : vector<8x4xf32> to vector<8x4xbf16>
    %104 = vector.extract_strided_slice %3 {offsets = [0, 48], sizes = [8, 4], strides = [1, 1]} : vector<8x96xf32> to vector<8x4xf32>
    %105 = arith.truncf %104 : vector<8x4xf32> to vector<8x4xbf16>
    %106 = vector.extract_strided_slice %3 {offsets = [0, 80], sizes = [8, 4], strides = [1, 1]} : vector<8x96xf32> to vector<8x4xf32>
    %107 = arith.truncf %106 : vector<8x4xf32> to vector<8x4xbf16>
    %cst_38 = arith.constant dense<0.000000e+00> : vector<8x8xf32>
    %108 = tpu.matmul %103, %105, %cst_38 {dimension_numbers = #tpu.dot_dimension_numbers<[1], [1], [0], [0], [0, 0, 1, 0], [], []>} : vector<8x4xbf16>, vector<8x4xbf16>, vector<8x8xf32> -> vector<8x8xf32>
    %cst_39 = arith.constant dense<0xFF800000> : vector<8xf32>
    %109 = vector.multi_reduction <maximumf>, %108, %cst_39 [1] : vector<8x8xf32> to vector<8xf32>
    %110 = vector.shape_cast %109 : vector<8xf32> to vector<8x1xf32>
    %111 = vector.broadcast %110 : vector<8x1xf32> to vector<8x8xf32>
    %112 = arith.subf %108, %111 : vector<8x8xf32>
    %113 = math.exp %112 : vector<8x8xf32>
    %cst_40 = arith.constant dense<0.000000e+00> : vector<8xf32>
    %114 = vector.multi_reduction <add>, %113, %cst_40 [1] : vector<8x8xf32> to vector<8xf32>
    %115 = vector.shape_cast %114 : vector<8xf32> to vector<8x1xf32>
    %116 = tpu.reciprocal %115 {approx = true} : vector<8x1xf32> -> vector<8x1xf32>
    %117 = vector.broadcast %116 : vector<8x1xf32> to vector<8x8xf32>
    %118 = arith.mulf %113, %117 : vector<8x8xf32>
    %c0_41 = arith.constant 0 : index
    %c4 = arith.constant 4 : index
    %c0_42 = arith.constant 0 : index
    %c0_43 = arith.constant 0 : index
    %119 = vector.load %arg6[%c0_41, %c4, %c0_42, %c0_43] : memref<1x8x8x8xf32, #tpu.memory_space<vmem>>, vector<1x1x8x8xf32>
    %120 = vector.shape_cast %119 : vector<1x1x8x8xf32> to vector<8x8xf32>
    %121 = vector.shape_cast %118 : vector<8x8xf32> to vector<1x1x8x8xf32>
    tpu.vector_store %arg6[%c0_41, %c4, %c0_42, %c0_43], %121 {strides = array<i32>} : memref<1x8x8x8xf32, #tpu.memory_space<vmem>>, vector<1x1x8x8xf32>,
    %122 = arith.truncf %118 : vector<8x8xf32> to vector<8x8xbf16>
    %cst_44 = arith.constant dense<0.000000e+00> : vector<8x4xf32>
    %123 = tpu.matmul %122, %107, %cst_44 {dimension_numbers = #tpu.dot_dimension_numbers<[1], [0], [0], [1], [0, 0, 1, 1], [], []>} : vector<8x8xbf16>, vector<8x4xbf16>, vector<8x4xf32> -> vector<8x4xf32>
    %124 = vector.extract_strided_slice %3 {offsets = [0, 20], sizes = [8, 4], strides = [1, 1]} : vector<8x96xf32> to vector<8x4xf32>
    %cst_45 = arith.constant 5.000000e-01 : f32
    %125 = vector.broadcast %cst_45 : f32 to vector<8x4xf32>
    %126 = arith.mulf %124, %125 : vector<8x4xf32>
    %127 = arith.truncf %126 : vector<8x4xf32> to vector<8x4xbf16>
    %128 = vector.extract_strided_slice %3 {offsets = [0, 52], sizes = [8, 4], strides = [1, 1]} : vector<8x96xf32> to vector<8x4xf32>
    %129 = arith.truncf %128 : vector<8x4xf32> to vector<8x4xbf16>
    %130 = vector.extract_strided_slice %3 {offsets = [0, 84], sizes = [8, 4], strides = [1, 1]} : vector<8x96xf32> to vector<8x4xf32>
    %131 = arith.truncf %130 : vector<8x4xf32> to vector<8x4xbf16>
    %cst_46 = arith.constant dense<0.000000e+00> : vector<8x8xf32>
    %132 = tpu.matmul %127, %129, %cst_46 {dimension_numbers = #tpu.dot_dimension_numbers<[1], [1], [0], [0], [0, 0, 1, 0], [], []>} : vector<8x4xbf16>, vector<8x4xbf16>, vector<8x8xf32> -> vector<8x8xf32>
    %cst_47 = arith.constant dense<0xFF800000> : vector<8xf32>
    %133 = vector.multi_reduction <maximumf>, %132, %cst_47 [1] : vector<8x8xf32> to vector<8xf32>
    %134 = vector.shape_cast %133 : vector<8xf32> to vector<8x1xf32>
    %135 = vector.broadcast %134 : vector<8x1xf32> to vector<8x8xf32>
    %136 = arith.subf %132, %135 : vector<8x8xf32>
    %137 = math.exp %136 : vector<8x8xf32>
    %cst_48 = arith.constant dense<0.000000e+00> : vector<8xf32>
    %138 = vector.multi_reduction <add>, %137, %cst_48 [1] : vector<8x8xf32> to vector<8xf32>
    %139 = vector.shape_cast %138 : vector<8xf32> to vector<8x1xf32>
    %140 = tpu.reciprocal %139 {approx = true} : vector<8x1xf32> -> vector<8x1xf32>
    %141 = vector.broadcast %140 : vector<8x1xf32> to vector<8x8xf32>
    %142 = arith.mulf %137, %141 : vector<8x8xf32>
    %c0_49 = arith.constant 0 : index
    %c5 = arith.constant 5 : index
    %c0_50 = arith.constant 0 : index
    %c0_51 = arith.constant 0 : index
    %143 = vector.load %arg6[%c0_49, %c5, %c0_50, %c0_51] : memref<1x8x8x8xf32, #tpu.memory_space<vmem>>, vector<1x1x8x8xf32>
    %144 = vector.shape_cast %143 : vector<1x1x8x8xf32> to vector<8x8xf32>
    %145 = vector.shape_cast %142 : vector<8x8xf32> to vector<1x1x8x8xf32>
    tpu.vector_store %arg6[%c0_49, %c5, %c0_50, %c0_51], %145 {strides = array<i32>} : memref<1x8x8x8xf32, #tpu.memory_space<vmem>>, vector<1x1x8x8xf32>,
    %146 = arith.truncf %142 : vector<8x8xf32> to vector<8x8xbf16>
    %cst_52 = arith.constant dense<0.000000e+00> : vector<8x4xf32>
    %147 = tpu.matmul %146, %131, %cst_52 {dimension_numbers = #tpu.dot_dimension_numbers<[1], [0], [0], [1], [0, 0, 1, 1], [], []>} : vector<8x8xbf16>, vector<8x4xbf16>, vector<8x4xf32> -> vector<8x4xf32>
    %148 = vector.extract_strided_slice %3 {offsets = [0, 24], sizes = [8, 4], strides = [1, 1]} : vector<8x96xf32> to vector<8x4xf32>
    %cst_53 = arith.constant 5.000000e-01 : f32
    %149 = vector.broadcast %cst_53 : f32 to vector<8x4xf32>
    %150 = arith.mulf %148, %149 : vector<8x4xf32>
    %151 = arith.truncf %150 : vector<8x4xf32> to vector<8x4xbf16>
    %152 = vector.extract_strided_slice %3 {offsets = [0, 56], sizes = [8, 4], strides = [1, 1]} : vector<8x96xf32> to vector<8x4xf32>
    %153 = arith.truncf %152 : vector<8x4xf32> to vector<8x4xbf16>
    %154 = vector.extract_strided_slice %3 {offsets = [0, 88], sizes = [8, 4], strides = [1, 1]} : vector<8x96xf32> to vector<8x4xf32>
    %155 = arith.truncf %154 : vector<8x4xf32> to vector<8x4xbf16>
    %cst_54 = arith.constant dense<0.000000e+00> : vector<8x8xf32>
    %156 = tpu.matmul %151, %153, %cst_54 {dimension_numbers = #tpu.dot_dimension_numbers<[1], [1], [0], [0], [0, 0, 1, 0], [], []>} : vector<8x4xbf16>, vector<8x4xbf16>, vector<8x8xf32> -> vector<8x8xf32>
    %cst_55 = arith.constant dense<0xFF800000> : vector<8xf32>
    %157 = vector.multi_reduction <maximumf>, %156, %cst_55 [1] : vector<8x8xf32> to vector<8xf32>
    %158 = vector.shape_cast %157 : vector<8xf32> to vector<8x1xf32>
    %159 = vector.broadcast %158 : vector<8x1xf32> to vector<8x8xf32>
    %160 = arith.subf %156, %159 : vector<8x8xf32>
    %161 = math.exp %160 : vector<8x8xf32>
    %cst_56 = arith.constant dense<0.000000e+00> : vector<8xf32>
    %162 = vector.multi_reduction <add>, %161, %cst_56 [1] : vector<8x8xf32> to vector<8xf32>
    %163 = vector.shape_cast %162 : vector<8xf32> to vector<8x1xf32>
    %164 = tpu.reciprocal %163 {approx = true} : vector<8x1xf32> -> vector<8x1xf32>
    %165 = vector.broadcast %164 : vector<8x1xf32> to vector<8x8xf32>
    %166 = arith.mulf %161, %165 : vector<8x8xf32>
    %c0_57 = arith.constant 0 : index
    %c6 = arith.constant 6 : index
    %c0_58 = arith.constant 0 : index
    %c0_59 = arith.constant 0 : index
    %167 = vector.load %arg6[%c0_57, %c6, %c0_58, %c0_59] : memref<1x8x8x8xf32, #tpu.memory_space<vmem>>, vector<1x1x8x8xf32>
    %168 = vector.shape_cast %167 : vector<1x1x8x8xf32> to vector<8x8xf32>
    %169 = vector.shape_cast %166 : vector<8x8xf32> to vector<1x1x8x8xf32>
    tpu.vector_store %arg6[%c0_57, %c6, %c0_58, %c0_59], %169 {strides = array<i32>} : memref<1x8x8x8xf32, #tpu.memory_space<vmem>>, vector<1x1x8x8xf32>,
    %170 = arith.truncf %166 : vector<8x8xf32> to vector<8x8xbf16>
    %cst_60 = arith.constant dense<0.000000e+00> : vector<8x4xf32>
    %171 = tpu.matmul %170, %155, %cst_60 {dimension_numbers = #tpu.dot_dimension_numbers<[1], [0], [0], [1], [0, 0, 1, 1], [], []>} : vector<8x8xbf16>, vector<8x4xbf16>, vector<8x4xf32> -> vector<8x4xf32>
    %172 = vector.extract_strided_slice %3 {offsets = [0, 28], sizes = [8, 4], strides = [1, 1]} : vector<8x96xf32> to vector<8x4xf32>
    %cst_61 = arith.constant 5.000000e-01 : f32
    %173 = vector.broadcast %cst_61 : f32 to vector<8x4xf32>
    %174 = arith.mulf %172, %173 : vector<8x4xf32>
    %175 = arith.truncf %174 : vector<8x4xf32> to vector<8x4xbf16>
    %176 = vector.extract_strided_slice %3 {offsets = [0, 60], sizes = [8, 4], strides = [1, 1]} : vector<8x96xf32> to vector<8x4xf32>
    %177 = arith.truncf %176 : vector<8x4xf32> to vector<8x4xbf16>
    %178 = vector.extract_strided_slice %3 {offsets = [0, 92], sizes = [8, 4], strides = [1, 1]} : vector<8x96xf32> to vector<8x4xf32>
    %179 = arith.truncf %178 : vector<8x4xf32> to vector<8x4xbf16>
    %cst_62 = arith.constant dense<0.000000e+00> : vector<8x8xf32>
    %180 = tpu.matmul %175, %177, %cst_62 {dimension_numbers = #tpu.dot_dimension_numbers<[1], [1], [0], [0], [0, 0, 1, 0], [], []>} : vector<8x4xbf16>, vector<8x4xbf16>, vector<8x8xf32> -> vector<8x8xf32>
    %cst_63 = arith.constant dense<0xFF800000> : vector<8xf32>
    %181 = vector.multi_reduction <maximumf>, %180, %cst_63 [1] : vector<8x8xf32> to vector<8xf32>
    %182 = vector.shape_cast %181 : vector<8xf32> to vector<8x1xf32>
    %183 = vector.broadcast %182 : vector<8x1xf32> to vector<8x8xf32>
    %184 = arith.subf %180, %183 : vector<8x8xf32>
    %185 = math.exp %184 : vector<8x8xf32>
    %cst_64 = arith.constant dense<0.000000e+00> : vector<8xf32>
    %186 = vector.multi_reduction <add>, %185, %cst_64 [1] : vector<8x8xf32> to vector<8xf32>
    %187 = vector.shape_cast %186 : vector<8xf32> to vector<8x1xf32>
    %188 = tpu.reciprocal %187 {approx = true} : vector<8x1xf32> -> vector<8x1xf32>
    %189 = vector.broadcast %188 : vector<8x1xf32> to vector<8x8xf32>
    %190 = arith.mulf %185, %189 : vector<8x8xf32>
    %c0_65 = arith.constant 0 : index
    %c7 = arith.constant 7 : index
    %c0_66 = arith.constant 0 : index
    %c0_67 = arith.constant 0 : index
    %191 = vector.load %arg6[%c0_65, %c7, %c0_66, %c0_67] : memref<1x8x8x8xf32, #tpu.memory_space<vmem>>, vector<1x1x8x8xf32>
    %192 = vector.shape_cast %191 : vector<1x1x8x8xf32> to vector<8x8xf32>
    %193 = vector.shape_cast %190 : vector<8x8xf32> to vector<1x1x8x8xf32>
    tpu.vector_store %arg6[%c0_65, %c7, %c0_66, %c0_67], %193 {strides = array<i32>} : memref<1x8x8x8xf32, #tpu.memory_space<vmem>>, vector<1x1x8x8xf32>,
    %194 = arith.truncf %190 : vector<8x8xf32> to vector<8x8xbf16>
    %cst_68 = arith.constant dense<0.000000e+00> : vector<8x4xf32>
    %195 = tpu.matmul %194, %179, %cst_68 {dimension_numbers = #tpu.dot_dimension_numbers<[1], [0], [0], [1], [0, 0, 1, 1], [], []>} : vector<8x8xbf16>, vector<8x4xbf16>, vector<8x4xf32> -> vector<8x4xf32>
    %196 = tpu.concatenate %27, %51, %75, %99, %123, %147, %171, %195 in 1 : vector<8x4xf32>, vector<8x4xf32>, vector<8x4xf32>, vector<8x4xf32>, vector<8x4xf32>, vector<8x4xf32>, vector<8x4xf32>, vector<8x4xf32> -> vector<8x32xf32>
    %197 = arith.truncf %196 : vector<8x32xf32> to vector<8x32xbf16>
    %c0_69 = arith.constant 0 : index
    %c0_70 = arith.constant 0 : index
    %198 = vector.load %arg3[%c0_69, %c0_70] : memref<32x32xbf16, #tpu.memory_space<vmem>>, vector<32x32xbf16>
    %cst_71 = arith.constant dense<0.000000e+00> : vector<8x32xf32>
    %199 = tpu.matmul %197, %198, %cst_71 {dimension_numbers = #tpu.dot_dimension_numbers<[1], [0], [0], [1], [0, 0, 1, 1], [], []>} : vector<8x32xbf16>, vector<32x32xbf16>, vector<8x32xf32> -> vector<8x32xf32>
    %c0_72 = arith.constant 0 : index
    %c0_73 = arith.constant 0 : index
    %200 = vector.load %arg4[%c0_72, %c0_73] : memref<1x32xf32, #tpu.memory_space<vmem>>, vector<1x32xf32>
    %201 = vector.broadcast %200 : vector<1x32xf32> to vector<8x32xf32>
    %202 = arith.addf %199, %201 : vector<8x32xf32>
    %c0_74 = arith.constant 0 : index
    %c0_75 = arith.constant 0 : index
    %c0_76 = arith.constant 0 : index
    %203 = vector.load %arg5[%c0_74, %c0_75, %c0_76] : memref<1x8x32xf32, #tpu.memory_space<vmem>>, vector<1x8x32xf32>
    %204 = vector.shape_cast %203 : vector<1x8x32xf32> to vector<8x32xf32>
    %205 = vector.shape_cast %202 : vector<8x32xf32> to vector<1x8x32xf32>
    tpu.vector_store %arg5[%c0_74, %c0_75, %c0_76], %205 {strides = array<i32>} : memref<1x8x32xf32, #tpu.memory_space<vmem>>, vector<1x8x32xf32>,
    return
  }
  func.func @transform_0(%arg0: i32) -> (i32, i32, i32) {
    %c0_i32 = arith.constant 0 : i32
    %c0_i32_0 = arith.constant 0 : i32
    %c0_i32_1 = arith.constant 0 : i32
    return %arg0, %c0_i32, %c0_i32_0 : i32, i32, i32
  }
  func.func @transform_1(%arg0: i32) -> (i32, i32) {
    %c0_i32 = arith.constant 0 : i32
    %c0_i32_0 = arith.constant 0 : i32
    %c0_i32_1 = arith.constant 0 : i32
    return %c0_i32, %c0_i32_0 : i32, i32
  }
  func.func @transform_2(%arg0: i32) -> (i32, i32) {
    %c0_i32 = arith.constant 0 : i32
    %c0_i32_0 = arith.constant 0 : i32
    %c0_i32_1 = arith.constant 0 : i32
    return %c0_i32, %c0_i32_0 : i32, i32
  }
  func.func @transform_3(%arg0: i32) -> (i32, i32) {
    %c0_i32 = arith.constant 0 : i32
    %c0_i32_0 = arith.constant 0 : i32
    %c0_i32_1 = arith.constant 0 : i32
    return %c0_i32, %c0_i32_0 : i32, i32
  }
  func.func @transform_4(%arg0: i32) -> (i32, i32, i32) {
    %c0_i32 = arith.constant 0 : i32
    %c0_i32_0 = arith.constant 0 : i32
    %c0_i32_1 = arith.constant 0 : i32
    return %arg0, %c0_i32, %c0_i32_0 : i32, i32, i32
  }
  func.func @transform_5(%arg0: i32) -> (i32, i32, i32, i32) {
    %c0_i32 = arith.constant 0 : i32
    %c0_i32_0 = arith.constant 0 : i32
    %c0_i32_1 = arith.constant 0 : i32
    %c0_i32_2 = arith.constant 0 : i32
    return %arg0, %c0_i32, %c0_i32_0, %c0_i32_1 : i32, i32, i32, i32
  }
}

</mosaic_0001>

<bundles_post_ra>
// kernel: attention_forward.1
= control target key start
LH: loop header
LB: loop body
LE: loop exit
PB: predicated region body
PF: predicated region fallthrough
CT: control target
= control target key end

     0   :  { %11 = vsyncpa [#allocation3], 0  ;;  %s2231_s0 = inlined_call_operand.vmem [shape: bf16[2,8,32], index: 0, kind: input, shape index: {}]   ;;  %s2232_s1 = inlined_call_operand.vmem [shape: bf16[32,96], index: 1, kind: input, shape index: {}]   ;;  %s2233_s2 = inlined_call_operand.vmem [shape: bf16[32,32], index: 2, kind: input, shape index: {}]   ;;  %s2234_s3 = inlined_call_operand.vmem [shape: f32[1,32], index: 3, kind: input, shape index: {}]   ;;  %s2235_s4 = inlined_call_operand.hbm [shape: f32[2,8,32], index: 4, kind: output, shape index: {0}]   ;;  %s2236_s5 = inlined_call_operand.hbm [shape: f32[2,8,8,8], index: 5, kind: output, shape index: {1}]  }
   0x1   :  { %13 = vsyncpa [#allocation3 + $0x1], 0 }
   0x2   :  { %14 = vsyncpa [#allocation5], 0 }
   0x3   :  { %16 = vsyncpa [#allocation5 + $0x1], 0  ;;  %s1893_s18 = smov 0   ;;  %s1895_s19 = smov 0  }
   0x4   :  { %s1897_s20 = smov 0   ;;  %s1899_s21 = smov 0  }
   0x5 LB: > { %s1914_s22 = sadd.s32 4294967295, %s1826_s21   ;;  %s1428_s23 = sadd.s32 4294967294, %s1826_s21   ;;  %s1826_s21 = sphi %s1899_s21, %s2242_s21   ;;  %s1822_s20 = sphi %s1897_s20, %s2241_s20   ;;  %s1818_s19 = sphi %s1895_s19, %s2240_s19   ;;  %s1814_s18 = sphi %s1893_s18, %s2239_s18  }
   0x6   : > { %s1918_s24 = sadd.s32 1, %s1826_s21   ;;  %s118_s25 = sadd.s32 1, %s1822_s20 }
   0x7   : > { %s115_s26 = ssub.s32 %s1826_s21, %s1918_s24  ;;  %p128_p0 = scmp.ne.s32.totalorder %s1822_s20, %s1818_s19 }
   0x8   : > { %p116_p1 = scmp.eq.s32.totalorder %s115_s26, 0  ;;  %p129_p2 = scmp.eq.s32.totalorder %s1914_s22, 1 }
   0x9   : > { %p134_p3 = scmp.ne.s32.totalorder %s1818_s19, %s1814_s18  ;;  %p135_p4 = scmp.eq.s32.totalorder %s1428_s23, 1 }
   0xa   : > { %s1929_s27 = scalar_select %p116_p1, %s1822_s20, %s118_s25  }
   0xb   : > { %p1931_p5 = por %p129_p2, %p128_p0  ;;  %p1935_p6 = por %p135_p4, %p134_p3 }
   0xc   : > { %p1431_p7 = scmp.ge.s32.totalorder %s1826_s21, 1  ;;  %p195_p8 = scmp.lt.s32.totalorder %s1826_s21, 3 }
   0xe   : > { %p196_p9 = pnand %p1431_p7, %p195_p8 }
   0xf   : > { %p227_p10 = scmp.lt.s32.totalorder (!%p196_p9), %s1914_s22, 1  ;;  %s1830_s14 = smov (!%p196_p9), 96  }
  0x10   : > { %199 = sbr.rel (%p196_p9) target bundleno = 1482 (0x5ca), region = 36  ;;  %s1831_s15 = smov (!%p196_p9), 124  }
  0x11   : > { %s1832_s16 = smov (!%p196_p9), 92   ;;  %s1833_s17 = smov (!%p196_p9), 88  }
  0x12   : > { %s1834_s23 = smov (!%p196_p9), 120   ;;  %s1835_s25 = smov (!%p196_p9), 84  }
  0x13   : > { %s1836_s26 = smov (!%p196_p9), 116   ;;  %s1837_s30 = smov (!%p196_p9), 80  }
  0x14   : > { %s1838_s6 = smov (!%p196_p9), 112   ;;  %s1839_s7 = smov (!%p196_p9), 76  }
  0x15   : > { %v1700_v0 = vld [vmem:[%s2232_s1 + $0x8] sm:$0xff]   ;;  %v1828_v1 = vmov 0.0   ;;  %v1701_v2 = vld [vmem:[%s2232_s1] sm:$0xff]   ;;  %vm1829_vm0 = vmmov 0   ;;  %s228_s9 = scalar_select %p227_p10, %s1914_s22, 1  ;;  %vm249_vm1 = vcmask 261120  }
  0x16   : > { %1511 = vmatprep.subr.bf16.mxu0 %v1828_v1  ;;  %1519 = vmatprep.subr.bf16.mxu1 %v1828_v1  ;;  %s1840_s8 = smov 108   ;;  %s1843_s11 = smov 68   ;;  %vm299_vm2 = vcmask 31744   ;;  %vm346_vm3 = vcmask 64512   ;;  %vm365_vm4 = vcmask 1043456   ;;  %vm1224_vm5 = vcmask 97280  }
  0x17   : > { %1512 = vmatpush3.bf16.msra.mxu0 %v1700_v0  ;;  %1515 = vmatprep.mubr.msk.bf16.mxu0 %vm1829_vm0, %v1828_v1  ;;  %s1434_s10 = sshll.u32 %s228_s9, 2  ;;  %s1841_s9 = smov 72   ;;  %vm1226_vm6 = vcmask 130048   ;;  %vm1228_vm7 = vcmask 162816   ;;  %vm1230_vm8 = vcmask 195584   ;;  %vm1232_vm9 = vcmask 228352  }
  0x18   : > { %1513 = vmatprep.subr.bf16.mxu0 %v1828_v1  ;;  %1521 = vmatprep.mubr.msk.bf16.mxu1 %vm1829_vm0, %v1828_v1  ;;  %s230_s13 = scalar_lea.vmem %s2231_s0, %s1434_s10  ;;  %s1842_s10 = smov 104  }
  0x19   : > { %v232_v3 = vld [vmem:[%s230_s13] sm:$0xf]  ;;  %s1844_s12 = smov 100   ;;  %s1845_s13 = smov 60  }
  0x1b   : > { %1514 = vmatpush3.bf16.msra.mxu0 %v1701_v2 }
  0x1c   : > { %1525 = vmatprep.subr.bf16.mxu0 %v1828_v1 }
  0x1e   : > { %1516 = vmatmul.mubr.msk.bf16.vlgmr.msra.gmra.mxu0 %vm249_vm1, %v232_v3 }
  0x1f   : > { %1527 = vmatprep.mubr.msk.bf16.mxu0 %vm1829_vm0, %v1828_v1 }
  0xde   : > { %v287_v4 = vpop.f32.mrf.mxu0 }
  0xdf   : > { %v293_v5 = vmul.f32 0.5, %v287_v4  ;;  %v1963_v6 = vpack.c.bf16 %v287_v4, %v287_v4 }
  0xe0   : > { %v1517_v7 = vpop.f32.mrf.mxu0 }
  0xe1   : > { %v294_v8 = vpack.c.bf16 %v293_v5, %v293_v5  ;;  %297 = vrot.lane.b32.xlu0 %v1963_v6, %s1830_s14  ;;  %s1846_s14 = smov 64  }
  0xe2   : > { %v290_v9 = vpop.f32.mrf.mxu0 }
  0xe3   : > { %410 = vrot.lane.b32.xlu1 %v294_v8, %s1831_s15  ;;  %s1847_s15 = smov 56  }
  0xe4   : > { %v1518_v10 = vpop.f32.mrf.mxu0 }
  0xe5   : > { %412 = vrot.lane.b32.xlu0 %v1963_v6, %s1832_s16  ;;  %s1848_s16 = smov 52  }
  0xe7   : > { %524 = vrot.lane.b32.xlu1 %v1963_v6, %s1833_s17  ;;  %s1849_s17 = smov 44  }
  0xe9   : > { %522 = vrot.lane.b32.xlu0 %v294_v8, %s1834_s23  ;;  %s1850_s23 = smov 40  }
  0xeb   : > { %636 = vrot.lane.b32.xlu1 %v1963_v6, %s1835_s25  ;;  %s1851_s25 = smov 36  }
  0xed   : > { %634 = vrot.lane.b32.xlu0 %v294_v8, %s1836_s26  ;;  %s1852_s26 = smov 48  }
  0xef   : > { %748 = vrot.lane.b32.xlu1 %v1963_v6, %s1837_s30  ;;  %s2072_s30 = sand.u32 1, %s1818_s19  }
  0xf1   : > { %746 = vrot.lane.b32.xlu0 %v294_v8, %s1838_s6  ;;  %s1433_s6 = sshll.u32 %s2072_s30, 6 }
  0xf3   : > { %860 = vrot.lane.b32.xlu1 %v1963_v6, %s1839_s7  ;;  %s2076_s7 = scalar_lea.vmem [#allocation4], %s1433_s6 }
  0xf5   : > { %858 = vrot.lane.b32.xlu0 %v294_v8, %s1840_s8  ;;  %s1853_s8 = smov 4  }
  0xf7   : > { %972 = vrot.lane.b32.xlu1 %v1963_v6, %s1841_s9  ;;  %s1854_s9 = smov 8  }
  0xf9   : > { %970 = vrot.lane.b32.xlu0 %v294_v8, %s1842_s10  ;;  %s1855_s10 = smov 12  }
  0xfb   : > { %1084 = vrot.lane.b32.xlu1 %v1963_v6, %s1843_s11  ;;  %s1856_s11 = smov 16  }
  0xfd   : > { %1082 = vrot.lane.b32.xlu0 %v294_v8, %s1844_s12 }
 0x153   : > { %v298_v11 = vpop.permute.xlu0 %297 }
 0x154   : > { %v304_v12 = vsel %vm299_vm2, %v298_v11, 0 }
 0x155   : > { %1520 = vmatpush3.bf16.xpose.msra.mxu1 %v304_v12  ;;  %v411_v14 = vpop.permute.xlu1 %410 }
 0x156   : > { %1531 = vmatprep.subr.bf16.mxu1 %v1828_v1 }
 0x157   : > { %v413_v13 = vpop.permute.xlu0 %412 }
 0x158   : > { %v418_v15 = vsel %vm299_vm2, %v413_v13, 0 }
 0x159   : > { %v525_v16 = vpop.permute.xlu1 %524 }
 0x15a   : > { %v530_v17 = vsel %vm299_vm2, %v525_v16, 0 }
 0x15b   : > { %v523_v19 = vpop.permute.xlu0 %522 }
 0x15c   : > { %1522 = vmatmul.mubr.msk.bf16.vlgmr.msra.gmra.mxu1 %vm299_vm2, %v294_v8 }
 0x15d   : > { %1532 = vmatpush3.bf16.xpose.msra.mxu1 %v418_v15  ;;  %1533 = vmatprep.mubr.msk.bf16.mxu1 %vm1829_vm0, %v1828_v1  ;;  %v637_v18 = vpop.permute.xlu1 %636 }
 0x15e   : > { %1543 = vmatprep.subr.bf16.mxu1 %v1828_v1  ;;  %v642_v20 = vsel %vm299_vm2, %v637_v18, 0 }
 0x15f   : > { %v635_v22 = vpop.permute.xlu0 %634 }
 0x161   : > { %v749_v21 = vpop.permute.xlu1 %748 }
 0x162   : > { %v754_v23 = vsel %vm299_vm2, %v749_v21, 0 }
 0x163   : > { %v747_v25 = vpop.permute.xlu0 %746 }
 0x164   : > { %1534 = vmatmul.mubr.msk.bf16.vlgmr.msra.gmra.mxu1 %vm299_vm2, %v411_v14 }
 0x165   : > { %1544 = vmatpush3.bf16.xpose.msra.mxu1 %v530_v17  ;;  %1545 = vmatprep.mubr.msk.bf16.mxu1 %vm1829_vm0, %v1828_v1  ;;  %v861_v24 = vpop.permute.xlu1 %860 }
 0x166   : > { %1555 = vmatprep.subr.bf16.mxu1 %v1828_v1  ;;  %v866_v26 = vsel %vm299_vm2, %v861_v24, 0 }
 0x167   : > { %v859_v28 = vpop.permute.xlu0 %858 }
 0x169   : > { %v973_v27 = vpop.permute.xlu1 %972 }
 0x16a   : > { %v978_v29 = vsel %vm299_vm2, %v973_v27, 0 }
 0x16b   : > { %v971_v31 = vpop.permute.xlu0 %970 }
 0x16c   : > { %1546 = vmatmul.mubr.msk.bf16.vlgmr.msra.gmra.mxu1 %vm299_vm2, %v523_v19 }
 0x16d   : > { %1556 = vmatpush3.bf16.xpose.msra.mxu1 %v642_v20  ;;  %1557 = vmatprep.mubr.msk.bf16.mxu1 %vm1829_vm0, %v1828_v1  ;;  %v1085_v30 = vpop.permute.xlu1 %1084 }
 0x16e   : > { %1567 = vmatprep.subr.bf16.mxu1 %v1828_v1  ;;  %v1090_v32 = vsel %vm299_vm2, %v1085_v30, 0 }
 0x16f   : > { %v1083_v33 = vpop.permute.xlu0 %1082 }
 0x174   : > { %1558 = vmatmul.mubr.msk.bf16.vlgmr.msra.gmra.mxu1 %vm299_vm2, %v635_v22 }
 0x175   : > { %1568 = vmatpush3.bf16.xpose.msra.mxu1 %v754_v23  ;;  %1569 = vmatprep.mubr.msk.bf16.mxu1 %vm1829_vm0, %v1828_v1 }
 0x176   : > { %1579 = vmatprep.subr.bf16.mxu1 %v1828_v1 }
 0x17c   : > { %1570 = vmatmul.mubr.msk.bf16.vlgmr.msra.gmra.mxu1 %vm299_vm2, %v747_v25 }
 0x17d   : > { %1580 = vmatpush3.bf16.xpose.msra.mxu1 %v866_v26  ;;  %1581 = vmatprep.mubr.msk.bf16.mxu1 %vm1829_vm0, %v1828_v1 }
 0x17e   : > { %1591 = vmatprep.subr.bf16.mxu1 %v1828_v1 }
 0x184   : > { %1582 = vmatmul.mubr.msk.bf16.vlgmr.msra.gmra.mxu1 %vm299_vm2, %v859_v28 }
 0x185   : > { %1592 = vmatpush3.bf16.xpose.msra.mxu1 %v978_v29  ;;  %1593 = vmatprep.mubr.msk.bf16.mxu1 %vm1829_vm0, %v1828_v1 }
 0x186   : > { %1603 = vmatprep.subr.bf16.mxu1 %v1828_v1 }
 0x18c   : > { %1594 = vmatmul.mubr.msk.bf16.vlgmr.msra.gmra.mxu1 %vm299_vm2, %v971_v31 }
 0x18d   : > { %1604 = vmatpush3.bf16.xpose.msra.mxu1 %v1090_v32  ;;  %1605 = vmatprep.mubr.msk.bf16.mxu1 %vm1829_vm0, %v1828_v1 }
 0x18e   : > { %1615 = vmatprep.subr.bf16.mxu1 %v1828_v1 }
 0x194   : > { %1606 = vmatmul.mubr.msk.bf16.vlgmr.msra.gmra.mxu1 %vm299_vm2, %v1083_v33 }
 0x195   : > { %1619 = vmatprep.mubr.msk.bf16.mxu1 %vm1829_vm0, %v1828_v1 }
 0x21c   : > { %v340_v34 = vpop.f32.mrf.mxu1 }
 0x21d   : > { %v347_v35 = vsel %vm346_vm3, %v340_v34, -inf }
 0x21e   : > { %348 = vmax.xlane.f32.xlu1 %v347_v35  ;;  %v1523_v36 = vpop.f32.mrf.mxu1 }
 0x220   : > { %v343_v37 = vpop.f32.mrf.mxu1 }
 0x222   : > { %v1524_v38 = vpop.f32.mrf.mxu1 }
 0x224   : > { %v454_v39 = vpop.f32.mrf.mxu1 }
 0x225   : > { %v460_v40 = vsel %vm346_vm3, %v454_v39, -inf }
 0x226   : > { %461 = vmax.xlane.f32.xlu0 %v460_v40  ;;  %v1535_v41 = vpop.f32.mrf.mxu1 }
 0x228   : > { %v457_v42 = vpop.f32.mrf.mxu1 }
 0x22a   : > { %v1536_v43 = vpop.f32.mrf.mxu1 }
 0x22c   : > { %v566_v44 = vpop.f32.mrf.mxu1 }
 0x22d   : > { %v572_v45 = vsel %vm346_vm3, %v566_v44, -inf }
 0x22e   : > { %573 = vmax.xlane.f32.xlu0 %v572_v45  ;;  %v1547_v46 = vpop.f32.mrf.mxu1 }
 0x230   : > { %v569_v47 = vpop.f32.mrf.mxu1 }
 0x232   : > { %v1548_v48 = vpop.f32.mrf.mxu1 }
 0x234   : > { %v678_v49 = vpop.f32.mrf.mxu1 }
 0x235   : > { %v684_v50 = vsel %vm346_vm3, %v678_v49, -inf }
 0x236   : > { %685 = vmax.xlane.f32.xlu1 %v684_v50  ;;  %v1559_v51 = vpop.f32.mrf.mxu1 }
 0x238   : > { %v681_v52 = vpop.f32.mrf.mxu1 }
 0x23a   : > { %v1560_v53 = vpop.f32.mrf.mxu1 }
 0x23c   : > { %v790_v54 = vpop.f32.mrf.mxu1 }
 0x23d   : > { %v796_v55 = vsel %vm346_vm3, %v790_v54, -inf }
 0x23e   : > { %797 = vmax.xlane.f32.xlu0 %v796_v55  ;;  %v1571_v56 = vpop.f32.mrf.mxu1 }
 0x240   : > { %v793_v57 = vpop.f32.mrf.mxu1 }
 0x242   : > { %v1572_v58 = vpop.f32.mrf.mxu1 }
 0x244   : > { %v2018_v59 = vpop.f32.mrf.mxu1 }
 0x245   : > { %v908_v60 = vsel %vm346_vm3, %v2018_v59, -inf }
 0x246   : > { %909 = vmax.xlane.f32.xlu1 %v908_v60  ;;  %v1583_v61 = vpop.f32.mrf.mxu1 }
 0x248   : > { %v905_v62 = vpop.f32.mrf.mxu1 }
 0x24a   : > { %v1584_v63 = vpop.f32.mrf.mxu1 }
 0x24c   : > { %v1014_v0 = vpop.f32.mrf.mxu1 }
 0x24d   : > { %v1020_v2 = vsel %vm346_vm3, %v1014_v0, -inf }
 0x24e   : > { %1021 = vmax.xlane.f32.xlu0 %v1020_v2  ;;  %v1595_v3 = vpop.f32.mrf.mxu1 }
 0x250   : > { %v1017_v4 = vpop.f32.mrf.mxu1 }
 0x252   : > { %v1596_v5 = vpop.f32.mrf.mxu1 }
 0x254   : > { %v2023_v7 = vpop.f32.mrf.mxu1 }
 0x255   : > { %v1132_v11 = vsel %vm346_vm3, %v2023_v7, -inf }
 0x256   : > { %v1607_v8 = vpop.f32.mrf.mxu1 }
 0x257   : > { %474 = vrot.lane.b32.xlu1 %v1963_v6, %s1845_s13  ;;  %s1860_s13 = smov [#allocation4]  }
 0x258   : > { %v1129_v9 = vpop.f32.mrf.mxu1 }
 0x25a   : > { %v1608_v10 = vpop.f32.mrf.mxu1 }
 0x264   : > { %360 = vrot.lane.b32.xlu0 %v1963_v6, %s1846_s14  ;;  %s1857_s14 = smov 20  }
 0x27b   : > { %1133 = vmax.xlane.f32.xlu1 %v1132_v11 }
 0x28c   : > { %586 = vrot.lane.b32.xlu1 %v1963_v6, %s1847_s15 }
 0x2a7   : > { %v349_v12 = vpop.xlane.xlu1 %348 }
 0x2a8   : > { %v350_v13 = vsub.f32 %v340_v34, %v349_v12 }
 0x2aa   : > { %v351_v14 = vmul.f32 1.442695, %v350_v13 }
 0x2ac   : > { %1704 = vpow2.f32 %v351_v14 }
 0x2af   : > { %v462_v15 = vpop.xlane.xlu0 %461 }
 0x2b0   : > { %v463_v16 = vsub.f32 %v454_v39, %v462_v15 }
 0x2b2   : > { %v464_v17 = vmul.f32 1.442695, %v463_v16 }
 0x2b4   : > { %1706 = vpow2.f32 %v464_v17 }
 0x2b7   : > { %v574_v18 = vpop.xlane.xlu0 %573 }
 0x2b8   : > { %v575_v19 = vsub.f32 %v566_v44, %v574_v18 }
 0x2b9   : > { %v2030_v20 = vpop.eup %1704 }
 0x2ba   : > { %v576_v21 = vmul.f32 1.442695, %v575_v19  ;;  %v353_v22 = vsel %vm346_vm3, %v2030_v20, 0.0 }
 0x2bb   : > { %354 = vadd.xlane.f32.xlu0 %v353_v22 }
 0x2bc   : > { %1708 = vpow2.f32 %v576_v21 }
 0x2bf   : > { %v686_v23 = vpop.xlane.xlu1 %685 }
 0x2c0   : > { %v687_v24 = vsub.f32 %v678_v49, %v686_v23 }
 0x2c1   : > { %v2034_v25 = vpop.eup %1706 }
 0x2c2   : > { %v688_v26 = vmul.f32 1.442695, %v687_v24  ;;  %v466_v27 = vsel %vm346_vm3, %v2034_v25, 0.0 }
 0x2c3   : > { %467 = vadd.xlane.f32.xlu1 %v466_v27 }
 0x2c4   : > { %1710 = vpow2.f32 %v688_v26 }
 0x2c7   : > { %v798_v28 = vpop.xlane.xlu0 %797 }
 0x2c8   : > { %v799_v29 = vsub.f32 %v790_v54, %v798_v28 }
 0x2c9   : > { %v2038_v30 = vpop.eup %1708 }
 0x2ca   : > { %v800_v31 = vmul.f32 1.442695, %v799_v29  ;;  %v578_v32 = vsel %vm346_vm3, %v2038_v30, 0.0 }
 0x2cb   : > { %579 = vadd.xlane.f32.xlu0 %v578_v32 }
 0x2cc   : > { %1712 = vpow2.f32 %v800_v31 }
 0x2cf   : > { %v910_v42 = vpop.xlane.xlu1 %909 }
 0x2d0   : > { %v911_v43 = vsub.f32 %v2018_v59, %v910_v42 }
 0x2d1   : > { %v2042_v33 = vpop.eup %1710 }
 0x2d2   : > { %v690_v34 = vsel %vm346_vm3, %v2042_v33, 0.0  ;;  %v912_v46 = vmul.f32 1.442695, %v911_v43 }
 0x2d3   : > { %691 = vadd.xlane.f32.xlu1 %v690_v34  ;;  %v475_v49 = vpop.permute.xlu1 %474 }
 0x2d7   : > { %v1022_v35 = vpop.xlane.xlu0 %1021 }
 0x2d8   : > { %v1023_v36 = vsub.f32 %v1014_v0, %v1022_v35 }
 0x2d9   : > { %v2046_v37 = vpop.eup %1712 }
 0x2da   : > { %v1024_v38 = vmul.f32 1.442695, %v1023_v36  ;;  %v802_v39 = vsel %vm346_vm3, %v2046_v37, 0.0 }
 0x2db   : > { %v361_v40 = vpop.permute.xlu0 %360  ;;  %803 = vadd.xlane.f32.xlu1 %v802_v39 }
 0x2dc   : > { %1714 = vpow2.f32 %v1024_v38  ;;  %v367_v41 = vsel %vm365_vm4, %v361_v40, 0 }
 0x2dd   : > { %1526 = vmatpush3.bf16.msra.mxu0 %v367_v41  ;;  %1716 = vpow2.f32 %v912_v46 }
 0x2de   : > { %1537 = vmatprep.subr.bf16.mxu0 %v1828_v1 }
 0x2e1   : > { %698 = vrot.lane.b32.xlu0 %v1963_v6, %s1848_s16 }
 0x2e9   : > { %v2054_v44 = vpop.eup %1714 }
 0x2ea   : > { %v1026_v45 = vsel %vm346_vm3, %v2054_v44, 0.0  ;;  %v2058_v47 = vpop.eup %1716 }
 0x2eb   : > { %1027 = vadd.xlane.f32.xlu1 %v1026_v45  ;;  %v914_v48 = vsel %vm346_vm3, %v2058_v47, 0.0 }
 0x300   : > { %915 = vadd.xlane.f32.xlu0 %v914_v48 }
 0x304   : > { %v1134_v50 = vpop.xlane.xlu1 %1133 }
 0x305   : > { %v1135_v51 = vsub.f32 %v2023_v7, %v1134_v50 }
 0x307   : > { %v1136_v52 = vmul.f32 1.442695, %v1135_v51 }
 0x308   : > { %v587_v56 = vpop.permute.xlu1 %586 }
 0x309   : > { %1718 = vpow2.f32 %v1136_v52  ;;  %v592_v3 = vsel %vm365_vm4, %v587_v56, 0  ;;  %v1702_v56 = vld [vmem:[%s2233_s2 + $0x8] sm:$0xff]  }
 0x30a   : > { %1616 = vmatpush3.bf16.msra.mxu1 %v1702_v56 }
 0x30b   : > { %1617 = vmatprep.subr.bf16.mxu1 %v1828_v1 }
 0x316   : > { %v2063_v53 = vpop.eup %1718  ;;  %922 = vrot.lane.b32.xlu0 %v1963_v6, %s1849_s17  ;;  %s1858_s17 = smov 24  }
 0x317   : > { %v1138_v54 = vsel %vm346_vm3, %v2063_v53, 0.0 }
 0x318   : > { %1139 = vadd.xlane.f32.xlu1 %v1138_v54 }
 0x31a   : > { %1034 = vrot.lane.b32.xlu0 %v1963_v6, %s1850_s23  ;;  %s1859_s23 = smov 28  }
 0x31e   : > { %1146 = vrot.lane.b32.xlu0 %v1963_v6, %s1851_s25  ;;  %s1334_s25 = sshll.u32 %s2076_s7, 4  ;;  %s2149_s25 = int_to_ptr.vmem [resolvable:$true] %s1334_s25 }
 0x31f   : > { %s1736_s12 = scalar_lea.vmem %s2149_s25, 1024 }
 0x320   : > { %p1737_p11 = scmp.ne.s32.totalorder %s2149_s25, %s1736_s12 }
 0x322   : > { %p1738_p12 = pnand %p1737_p11, %p1931_p5 }
 0x324   : > { %p1739_p13 = pneg %p1738_p12 }
 0x329   : > { %810 = vrot.lane.b32.xlu1 %v1963_v6, %s1852_s26  ;;  %v480_v6 = vsel %vm365_vm4, %v475_v49, 0  ;;  %s1472_s26 = sshll.u32 %s1914_s22, 10 }
 0x344   : > { %v355_v55 = vpop.xlane.xlu0 %354 }
 0x345   : > { %1720 = vrcp.f32 %v355_v55 }
 0x34c   : > { %v468_v57 = vpop.xlane.xlu1 %467 }
 0x34d   : > { %1722 = vrcp.f32 %v468_v57 }
 0x352   : > { %v1721_v58 = vpop.eup %1720 }
 0x353   : > { %v357_v59 = vmul.f32 %v1721_v58, %v2030_v20 }
 0x354   : > { %v580_v60 = vpop.xlane.xlu0 %579 }
 0x355   : > { %1724 = vrcp.f32 %v580_v60  ;;  %v359_v61 = vpack.c.bf16 %v357_v59, %v357_v59  ;;  %358 = vst.msk [vmem:[%s2076_s7] sm:$0xff] %vm346_vm3, %v357_v59  ;;  %v1703_v60 = vld [vmem:[%s2233_s2] sm:$0xff]  }
 0x356   : > { %1618 = vmatpush3.bf16.msra.mxu1 %v1703_v60 }
 0x357   : > { %1528 = vmatmul.mubr.msk.bf16.vlgmr.msra.gmra.mxu0 %vm346_vm3, %v359_v61 }
 0x358   : > { %1538 = vmatpush3.bf16.msra.mxu0 %v480_v6  ;;  %1539 = vmatprep.mubr.msk.bf16.mxu0 %vm1829_vm0, %v1828_v1  ;;  %v699_v7 = vpop.permute.xlu0 %698 }
 0x359   : > { %1549 = vmatprep.subr.bf16.mxu0 %v1828_v1  ;;  %v704_v10 = vsel %vm365_vm4, %v699_v7, 0 }
 0x35a   : > { %v1723_v62 = vpop.eup %1722 }
 0x35b   : > { %v470_v63 = vmul.f32 %v1723_v62, %v2034_v25 }
 0x35c   : > { %v692_v0 = vpop.xlane.xlu1 %691 }
 0x35d   : > { %1726 = vrcp.f32 %v692_v0  ;;  %v473_v2 = vpack.c.bf16 %v470_v63, %v470_v63  ;;  %1441 = vst.msk [vmem:[%s2076_s7 + $0x8] sm:$0xff] %vm346_vm3, %v470_v63 }
 0x35f   : > { %1540 = vmatmul.mubr.msk.bf16.vlgmr.msra.gmra.mxu0 %vm346_vm3, %v473_v2 }
 0x360   : > { %1550 = vmatpush3.bf16.msra.mxu0 %v592_v3  ;;  %1551 = vmatprep.mubr.msk.bf16.mxu0 %vm1829_vm0, %v1828_v1 }
 0x361   : > { %1561 = vmatprep.subr.bf16.mxu0 %v1828_v1 }
 0x362   : > { %v1725_v4 = vpop.eup %1724 }
 0x363   : > { %v582_v5 = vmul.f32 %v1725_v4, %v2038_v30 }
 0x364   : > { %v804_v8 = vpop.xlane.xlu1 %803 }
 0x365   : > { %1728 = vrcp.f32 %v804_v8  ;;  %v585_v9 = vpack.c.bf16 %v582_v5, %v582_v5  ;;  %1444 = vst.msk [vmem:[%s2076_s7 + $0x10] sm:$0xff] %vm346_vm3, %v582_v5 }
 0x367   : > { %1552 = vmatmul.mubr.msk.bf16.vlgmr.msra.gmra.mxu0 %vm346_vm3, %v585_v9 }
 0x368   : > { %1562 = vmatpush3.bf16.msra.mxu0 %v704_v10  ;;  %1563 = vmatprep.mubr.msk.bf16.mxu0 %vm1829_vm0, %v1828_v1 }
 0x369   : > { %1573 = vmatprep.subr.bf16.mxu0 %v1828_v1 }
 0x36a   : > { %v1727_v11 = vpop.eup %1726 }
 0x36b   : > { %v694_v12 = vmul.f32 %v1727_v11, %v2042_v33 }
 0x36d   : > { %v697_v13 = vpack.c.bf16 %v694_v12, %v694_v12  ;;  %1447 = vst.msk [vmem:[%s2076_s7 + $0x18] sm:$0xff] %vm346_vm3, %v694_v12 }
 0x36f   : > { %1564 = vmatmul.mubr.msk.bf16.vlgmr.msra.gmra.mxu0 %vm346_vm3, %v697_v13 }
 0x370   : > { %1575 = vmatprep.mubr.msk.bf16.mxu0 %vm1829_vm0, %v1828_v1 }
 0x372   : > { %v1729_v14 = vpop.eup %1728 }
 0x373   : > { %v806_v15 = vmul.f32 %v1729_v14, %v2046_v37 }
 0x374   : > { %v1028_v16 = vpop.xlane.xlu1 %1027 }
 0x375   : > { %1730 = vrcp.f32 %v1028_v16  ;;  %1450 = vst.msk [vmem:[%s2076_s7 + $0x20] sm:$0xff] %vm346_vm3, %v806_v15  ;;  %v809_v26 = vpack.c.bf16 %v806_v15, %v806_v15 }
 0x382   : > { %v1731_v17 = vpop.eup %1730 }
 0x383   : > { %v1030_v18 = vmul.f32 %v1731_v17, %v2054_v44 }
 0x385   : > { %1456 = vst.msk [vmem:[%s2076_s7 + $0x30] sm:$0xff] %vm346_vm3, %v1030_v18  ;;  %v1033_v34 = vpack.c.bf16 %v1030_v18, %v1030_v18 }
 0x389   : > { %v916_v19 = vpop.xlane.xlu0 %915 }
 0x38a   : > { %1732 = vrcp.f32 %v916_v19 }
 0x38d   : > { %v923_v25 = vpop.permute.xlu0 %922 }
 0x38e   : > { %v928_v27 = vsel %vm365_vm4, %v923_v25, 0 }
 0x391   : > { %v1035_v29 = vpop.permute.xlu0 %1034 }
 0x392   : > { %v1040_v32 = vsel %vm365_vm4, %v1035_v29, 0 }
 0x395   : > { %v1147_v33 = vpop.permute.xlu0 %1146 }
 0x396   : > { %v1152_v35 = vsel %vm365_vm4, %v1147_v33, 0 }
 0x397   : > { %v1733_v20 = vpop.eup %1732 }
 0x398   : > { %v918_v21 = vmul.f32 %v1733_v20, %v2058_v47 }
 0x39a   : > { %1453 = vst.msk [vmem:[%s2076_s7 + $0x28] sm:$0xff] %vm346_vm3, %v918_v21  ;;  %v921_v30 = vpack.c.bf16 %v918_v21, %v918_v21 }
 0x3a1   : > { %v1140_v22 = vpop.xlane.xlu1 %1139 }
 0x3a2   : > { %1734 = vrcp.f32 %v1140_v22 }
 0x3a5   : > { %v811_v23 = vpop.permute.xlu1 %810 }
 0x3a6   : > { %v816_v24 = vsel %vm365_vm4, %v811_v23, 0 }
 0x3a7   : > { %1574 = vmatpush3.bf16.msra.mxu0 %v816_v24 }
 0x3a8   : > { %1585 = vmatprep.subr.bf16.mxu0 %v1828_v1 }
 0x3aa   : > { %1576 = vmatmul.mubr.msk.bf16.vlgmr.msra.gmra.mxu0 %vm346_vm3, %v809_v26 }
 0x3ab   : > { %1586 = vmatpush3.bf16.msra.mxu0 %v928_v27  ;;  %1587 = vmatprep.mubr.msk.bf16.mxu0 %vm1829_vm0, %v1828_v1 }
 0x3ac   : > { %1597 = vmatprep.subr.bf16.mxu0 %v1828_v1 }
 0x3af   : > { %v1735_v28 = vpop.eup %1734 }
 0x3b0   : > { %v1142_v31 = vmul.f32 %v1735_v28, %v2063_v53 }
 0x3b2   : > { %1588 = vmatmul.mubr.msk.bf16.vlgmr.msra.gmra.mxu0 %vm346_vm3, %v921_v30  ;;  %1459 = vst.msk [vmem:[%s2076_s7 + $0x38] sm:$0xff] %vm346_vm3, %v1142_v31  ;;  %v1145_v36 = vpack.c.bf16 %v1142_v31, %v1142_v31 }
 0x3b3   : > { %1598 = vmatpush3.bf16.msra.mxu0 %v1040_v32  ;;  %1599 = vmatprep.mubr.msk.bf16.mxu0 %vm1829_vm0, %v1828_v1 }
 0x3b4   : > { %1609 = vmatprep.subr.bf16.mxu0 %v1828_v1 }
 0x3ba   : > { %1600 = vmatmul.mubr.msk.bf16.vlgmr.msra.gmra.mxu0 %vm346_vm3, %v1033_v34 }
 0x3bb   : > { %1610 = vmatpush3.bf16.msra.mxu0 %v1152_v35  ;;  %1611 = vmatprep.mubr.msk.bf16.mxu0 %vm1829_vm0, %v1828_v1 }
 0x3c2   : > { %1612 = vmatmul.mubr.msk.bf16.vlgmr.msra.gmra.mxu0 %vm346_vm3, %v1145_v36 }
 0x417   : > { %v403_v37 = vpop.f32.mrf.mxu0 }
 0x419   : > { %v1529_v38 = vpop.f32.mrf.mxu0 }
 0x41b   : > { %v406_v39 = vpop.f32.mrf.mxu0 }
 0x41d   : > { %v1530_v40 = vpop.f32.mrf.mxu0 }
 0x41f   : > { %v516_v41 = vpop.f32.mrf.mxu0 }
 0x420   : > { %1195 = vrot.lane.b32.xlu1 %v516_v41, %s1853_s8 }
 0x421   : > { %v1541_v42 = vpop.f32.mrf.mxu0 }
 0x423   : > { %v519_v43 = vpop.f32.mrf.mxu0 }
 0x425   : > { %v1542_v44 = vpop.f32.mrf.mxu0 }
 0x427   : > { %v628_v45 = vpop.f32.mrf.mxu0 }
 0x428   : > { %1199 = vrot.lane.b32.xlu0 %v628_v45, %s1854_s9 }
 0x429   : > { %v1553_v46 = vpop.f32.mrf.mxu0 }
 0x42b   : > { %v631_v47 = vpop.f32.mrf.mxu0 }
 0x42d   : > { %v1554_v48 = vpop.f32.mrf.mxu0 }
 0x42f   : > { %v740_v49 = vpop.f32.mrf.mxu0 }
 0x430   : > { %1203 = vrot.lane.b32.xlu1 %v740_v49, %s1855_s10  ;;  %s2154_s10 = scalar_lea.hbm %s2236_s5, %s1472_s26 }
 0x431   : > { %v1565_v50 = vpop.f32.mrf.mxu0 }
 0x433   : > { %v743_v51 = vpop.f32.mrf.mxu0 }
 0x435   : > { %v1566_v52 = vpop.f32.mrf.mxu0 }
 0x46a   : > { %v852_v53 = vpop.f32.mrf.mxu0 }
 0x46b   : > { %1207 = vrot.lane.b32.xlu0 %v852_v53, %s1856_s11  ;;  %s1308_s11 = scalar_lea.sflag [#allocation5], %s2072_s30 }
 0x46c   : > { %v1577_v54 = vpop.f32.mrf.mxu0 }
 0x46e   : > { %v855_v55 = vpop.f32.mrf.mxu0 }
 0x470   : > { %v1578_v57 = vpop.f32.mrf.mxu0 }
 0x472   : > { %v964_v58 = vpop.f32.mrf.mxu0 }
 0x473   : > { %1211 = vrot.lane.b32.xlu1 %v964_v58, %s1857_s14  ;;  %s1740_s14 = sshll.u32 %s1860_s13, 4  ;;  %s1741_s14 = int_to_ptr.vmem [resolvable:$false] %s1740_s14 }
 0x474   : > { %v1589_v59 = vpop.f32.mrf.mxu0  ;;  %s1742_s7 = scalar_lea.vmem %s1741_s14, 2048  ;;  %p1743_p0 = scmp.lt.s32.totalorder %s2149_s25, %s1741_s14 }
 0x475   : > { %p1744_p1 = scmp.lt.s32.totalorder %s1742_s7, %s1736_s12 }
 0x476   : > { %v967_v61 = vpop.f32.mrf.mxu0 }
 0x477   : > { %p1745_p2 = por %p1744_p1, %p1743_p0 }
 0x478   : > { %v1590_v6 = vpop.f32.mrf.mxu0 }
 0x479   : > { %p1746_p3 = pnand %p1745_p2, %p1739_p13 }
 0x47a   : > { %v1076_v62 = vpop.f32.mrf.mxu0 }
 0x47b   : > { %1215 = vrot.lane.b32.xlu0 %v1076_v62, %s1858_s17 }
 0x47c   : > { %v1601_v63 = vpop.f32.mrf.mxu0 }
 0x47e   : > { %v1079_v0 = vpop.f32.mrf.mxu0 }
 0x480   : > { %v1602_v2 = vpop.f32.mrf.mxu0 }
 0x482   : > { %v1188_v3 = vpop.f32.mrf.mxu0 }
 0x483   : > { %1219 = vrot.lane.b32.xlu1 %v1188_v3, %s1859_s23 }
 0x484   : > { %v1613_v1 = vpop.f32.mrf.mxu0 }
 0x486   : > { %v1191_v4 = vpop.f32.mrf.mxu0 }
 0x488   : > { %v1614_v5 = vpop.f32.mrf.mxu0 }
 0x492   : > { %v1196_v7 = vpop.permute.xlu1 %1195 }
 0x493   : > { %v1222_v11 = vsel %vm299_vm2, %v403_v37, %v1196_v7 }
 0x49a   : > { %v1200_v8 = vpop.permute.xlu0 %1199 }
 0x49b   : > { %v1223_v12 = vsel %vm346_vm3, %v1222_v11, %v1200_v8 }
 0x4a2   : > { %v1204_v9 = vpop.permute.xlu1 %1203 }
 0x4a3   : > { %v1225_v14 = vsel %vm1224_vm5, %v1223_v12, %v1204_v9 }
 0x4dd   : > { %v1208_v10 = vpop.permute.xlu0 %1207 }
 0x4de   : > { %v1227_v16 = vsel %vm1226_vm6, %v1225_v14, %v1208_v10 }
 0x4e5   : > { %v1212_v13 = vpop.permute.xlu1 %1211 }
 0x4e6   : > { %v1229_v17 = vsel %vm1228_vm7, %v1227_v16, %v1212_v13 }
 0x4ed   : > { %v1216_v15 = vpop.permute.xlu0 %1215 }
 0x4ee   : > { %v1231_v18 = vsel %vm1230_vm8, %v1229_v17, %v1216_v15 }
 0x4f5   : > { %v1220_v19 = vpop.permute.xlu1 %1219 }
 0x4f6   : > { %v1233_v20 = vsel %vm1232_vm9, %v1231_v18, %v1220_v19 }
 0x4f7   : > { %v1234_v21 = vpack.c.bf16 %v1233_v20, %v1233_v20 }
 0x4f9   : > { %1620 = vmatmul.mubr.msk.bf16.vlgmr.msra.gmra.mxu1 %vm249_vm1, %v1234_v21 }
 0x4fa   : > { %1749 = shalt.err (!%p1746_p3)
}
 0x4fb   : > { %s1750_s15 = scalar_lea.hbm %s2154_s10, 1024  ;;  %s1754_s23 = scalar_lea.hbm %s2236_s5, 2048 }
 0x4fc   : > { %p1751_p4 = scmp.ne.s32.totalorder %s2154_s10, %s1750_s15  ;;  %p1755_p9 = scmp.lt.s32.totalorder %s2154_s10, %s2236_s5 }
 0x4fd   : > { %p1756_p10 = scmp.lt.s32.totalorder %s1754_s23, %s1750_s15 }
 0x4fe   : > { %p1752_p7 = pnand %p1751_p4, %p1931_p5 }
 0x4ff   : > { %p1757_p11 = por %p1756_p10, %p1755_p9 }
 0x500   : > { %p1753_p8 = pneg %p1752_p7 }
 0x502   : > { %p1758_p12 = pnand %p1757_p11, %p1753_p8 }
 0x504   : > { %1761 = shalt.err (!%p1758_p12)
}
 0x505   : > { %s1861_s8 = smov 128   ;;  %s1432_s12 = sshll.u32 %s2072_s30, 3  ;;  %v1461_v22 = vld [vmem:[%s2234_s3] ss:$0 sm:$0xff] }
 0x506   : > { %1624 = dma.vmem_to_hbm [thread:$0]  (%p1931_p5), %s2149_s25, 1024, %s2154_s10, %s1308_s11, %s1861_s8, %s1861_s8, %s1854_s9  }
 0x507   : > { %s1467_s7 = sshll.u32 %s1914_s22, 7  ;;  %s219_s15 = scalar_lea.vmem [#allocation2], %s1432_s12 }
 0x508   : > { %s1321_s16 = sshll.u32 %s219_s15, 4  ;;  %s2188_s26 = scalar_lea.hbm %s2235_s4, %s1467_s7  ;;  %s2190_s16 = int_to_ptr.vmem [resolvable:$true] %s1321_s16 }
 0x509   : > { %s1303_s9 = scalar_lea.sflag [#allocation3], %s2072_s30  ;;  %s1762_s22 = scalar_lea.vmem %s2190_s16, 128 }
 0x50a   : > { %p1763_p13 = scmp.ne.s32.totalorder %s2190_s16, %s1762_s22  ;;  %s1862_s25 = smov [#allocation2]  }
 0x50b   : > { %s1766_s10 = sshll.u32 %s1862_s25, 4  ;;  %s1767_s10 = int_to_ptr.vmem [resolvable:$false] %s1766_s10 }
 0x50c   : > { %p1764_p0 = pnand %p1763_p13, %p1931_p5  ;;  %s1768_s11 = scalar_lea.vmem %s1767_s10, 256 }
 0x50d   : > { %p1769_p2 = scmp.lt.s32.totalorder %s2190_s16, %s1767_s10  ;;  %p1770_p3 = scmp.lt.s32.totalorder %s1768_s11, %s1762_s22 }
 0x50e   : > { %p1765_p1 = pneg %p1764_p0 }
 0x50f   : > { %p1771_p4 = por %p1770_p3, %p1769_p2 }
 0x511   : > { %p1772_p7 = pnand %p1771_p4, %p1765_p1 }
 0x5b9   : > { %v1295_v23 = vpop.f32.mrf.mxu1 }
 0x5ba   : > { %v1296_v24 = vadd.f32 %v1461_v22, %v1295_v23 }
 0x5bb   : > { %v1621_v25 = vpop.f32.mrf.mxu1 }
 0x5bc   : > { %1301 = vst.msk [vmem:[%s219_s15] sm:$0xff] %vm249_vm1, %v1296_v24 }
 0x5bd   : > { %v1298_v26 = vpop.f32.mrf.mxu1 }
 0x5be   : > { %1775 = shalt.err (!%p1772_p7)
}
 0x5bf   : > { %s1776_s6 = scalar_lea.hbm %s2188_s26, 128  ;;  %s1780_s12 = scalar_lea.hbm %s2235_s4, 256 }
 0x5c0   : > { %p1777_p8 = scmp.ne.s32.totalorder %s2188_s26, %s1776_s6  ;;  %p1781_p11 = scmp.lt.s32.totalorder %s2188_s26, %s2235_s4 }
 0x5c1   : > { %p1782_p12 = scmp.lt.s32.totalorder %s1780_s12, %s1776_s6 }
 0x5c2   : > { %p1778_p9 = pnand %p1777_p8, %p1931_p5 }
 0x5c3   : > { %p1783_p13 = por %p1782_p12, %p1781_p11 }
 0x5c4   : > { %p1779_p10 = pneg %p1778_p9 }
 0x5c6   : > { %p1784_p0 = pnand %p1783_p13, %p1779_p10 }
 0x5c8   : > { %1787 = shalt.err (!%p1784_p0)
}
 0x5c9   : > { %1623 = dma.vmem_to_hbm [thread:$0]  (%p1931_p5), %s2190_s16, 128, %s2188_s26, %s1303_s9   ;;  %v1622_v27 = vpop.f32.mrf.mxu1 }
 0x5ca PF: > { %p1634_p1 = scmp.ge.s32.totalorder %s1826_s21, 2  ;;  %s1349_s7 = sand.u32 1, %s1814_s18  }
 0x5cb   : > { %s1350_s15 = scalar_lea.sflag [#allocation3], %s1349_s7 }
 0x5cc   : > { %p1628_p2 = pnand %p1634_p1, %p1935_p6 }
 0x5ce   : > { %p1629_p3 = pneg %p1628_p2 }
 0x5d0   : > { %1805 = dma.done.wait (%p1629_p3), %s1350_s15, 128  }
 0x5d1   : > { %1807 = vsyncadd (%p1629_p3), %s1350_s15, 4294967168  ;;  %s1359_s17 = scalar_lea.sflag [#allocation5], %s1349_s7 }
 0x5d2   : > { %1809 = dma.done.wait (%p1629_p3), %s1359_s17, 1024  }
 0x5d3   : > { %1811 = vsyncadd (%p1629_p3), %s1359_s17, 4294966272  ;;  %p19_p5 = scmp.ge.s32.totalorder %s1918_s24, 4   ;;  %s2239_s18 = smov %s1818_s19 }
 0x5d4   : > { %s2240_s19 = smov %s1822_s20  ;;  %s2241_s20 = smov %s1929_s27 }
 0x5d5   : > { %s2242_s21 = smov %s1918_s24  ;;  %21 = sbr.rel (!%p19_p5) target bundleno = 5 (0x5), region = 95 }
 0x5da   :  { %1364 = vsyncpa [#allocation3], 1 }
 0x5db   :  { %1366 = vsyncpa [#allocation3 + $0x1], 1 }
 0x5dc   :  { %1367 = vsyncpa [#allocation5], 1 }
 0x5dd   :  { %1369 = vsyncpa [#allocation5 + $0x1], 1 }

</bundles_post_ra>
